<compile_context>
chip_gen: v7x
topology: tpu7x:2x2x1
jax: 0.10.0
libtpu: 0.0.40
codegen_flags: <defaults>
</compile_context>

<pallas_src>
import functools

import jax
import jax.numpy as jnp
from jax.experimental import pallas as pl
from jax.experimental.pallas import tpu as pltpu

_LANE = 128       # lane padding for all feature dims (use 256 on v6e/v7x if
                  # the real hidden dims are tunable and large)
_SUBLANE = 8
_NEG_BIG = -1e30  # pad value for fake class logits; exp() underflows to 0


def _round_up(n, m):
    return ((n + m - 1) // m) * m


def _cdiv(a, b):
    return (a + b - 1) // b


def _bnn_forward_kernel(x_ref, w1_ref, b1_ref, w2_ref, b2_ref, w3_ref, b3_ref,
                        out_ref, *, use_relu: bool):
    """One batch tile: 3 MXU matmuls (bf16 in, f32 acc) + f32 elementwise."""

    def act(v):
        if use_relu:
            return jnp.maximum(v, 0.0)
        return jnp.tanh(v)

    x = x_ref[...]  # bf16 (TB, IN_P)

    # layer1: weights already transposed to (in, out) -> no in-kernel .T
    h1 = jnp.dot(x, w1_ref[...], preferred_element_type=jnp.float32)
    h1 = act(h1 + b1_ref[...])                      # f32 elementwise

    # layer2
    h2 = jnp.dot(h1.astype(jnp.bfloat16), w2_ref[...],
                 preferred_element_type=jnp.float32)
    h2 = act(h2 + b2_ref[...])

    # layer3 (logits); padded classes carry a -1e30 bias
    z = jnp.dot(h2.astype(jnp.bfloat16), w3_ref[...],
                preferred_element_type=jnp.float32)
    z = z + b3_ref[...]

    # log_softmax along the class axis, numerically stable, f32.
    m = jnp.max(z, axis=1, keepdims=True)
    shifted = z - m
    lse = jnp.log(jnp.sum(jnp.exp(shifted), axis=1, keepdims=True))
    # NOTE: padded class columns hold ~-1e30 here; the wrapper slices them off.
    out_ref[...] = (shifted - lse).astype(out_ref.dtype)


def prepare_params(params, lane=_LANE):
    """One-time weight prep: transpose to (in,out), lane-pad, cast to bf16.

    Call once per parameter set and reuse across forward calls (hoists all
    per-call weight HBM traffic out of the inference hot path).
    """
    nodes, in_dim = params["w1"].shape
    num_classes = params["w3"].shape[0]

    in_p = _round_up(in_dim, lane)
    h_p = _round_up(nodes, lane)
    c_p = _round_up(num_classes, lane)

    def prep_w(w, in_pad, out_pad):
        wt = w.T
        wt = jnp.pad(wt, ((0, in_pad - wt.shape[0]), (0, out_pad - wt.shape[1])))
        return wt.astype(jnp.bfloat16)

    return {
        "w1": prep_w(params["w1"], in_p, h_p),
        "w2": prep_w(params["w2"], h_p, h_p),
        "w3": prep_w(params["w3"], h_p, c_p),
        "b1": jnp.pad(params["b1"].astype(jnp.float32).reshape(1, -1),
                      ((0, 0), (0, h_p - nodes))),
        "b2": jnp.pad(params["b2"].astype(jnp.float32).reshape(1, -1),
                      ((0, 0), (0, h_p - nodes))),
        # Padded class logits get a huge negative bias so exp() -> exactly 0.
        "b3": jnp.pad(params["b3"].astype(jnp.float32).reshape(1, -1),
                      ((0, 0), (0, c_p - num_classes)),
                      constant_values=_NEG_BIG),
    }


def _resident_spec(shape):
    """Constant-index_map VMEM-resident block; single-buffered when supported."""
    try:
        return pl.BlockSpec(shape, lambda i: (0, 0),
                            pipeline_mode=pl.Buffered(1))
    except Exception:  # older jax without pipeline_mode / Buffered
        return pl.BlockSpec(shape, lambda i: (0, 0))


def bnn_forward(x, prepped, *, num_classes, activation="relu",
                block_b=2048, out_dtype=jnp.bfloat16):
    """Forward pass. `prepped` comes from prepare_params() (hoisted prep)."""
    B, in_dim = x.shape
    in_p, h_p = prepped["w1"].shape
    c_p = prepped["w3"].shape[1]
    assert in_dim <= in_p and num_classes <= c_p

    out_bytes = jnp.dtype(out_dtype).itemsize

    # --- batch tile selection -------------------------------------------------
    # Per-row VMEM cost estimate: double-buffered bf16 x tile + out tile, plus
    # ~6 live f32 (TB, h_p) intermediates and 2 f32 (TB, c_p) intermediates.
    bytes_per_row = (2 * in_p * 2) + (2 * c_p * out_bytes) \
        + 6 * h_p * 4 + 2 * c_p * 4
    # Weights/biases: assume worst case double-buffered (Buffered(1) may halve).
    weight_bytes = 2 * 2 * (in_p * h_p + h_p * h_p + h_p * c_p) \
        + 2 * 4 * (2 * h_p + c_p)
    vmem_budget = 48 * 1024 * 1024  # conservative: fits v7x's 64 MiB VMEM
    row_cap = max(_SUBLANE, (vmem_budget - weight_bytes) // bytes_per_row)
    row_cap = (row_cap // _SUBLANE) * _SUBLANE
    block_b = max(_SUBLANE, min(block_b, row_cap))

    # Even split of B into cdiv(B, block_b) tiles (avoids near-2x padding when
    # B is just over a tile boundary); force >=2 tiles for moderate batches so
    # the "parallel" batch axis actually splits across both v7x TensorCores.
    num_tiles = _cdiv(B, block_b)
    if num_tiles == 1 and B >= 2 * _SUBLANE:
        num_tiles = 2
    TB = _round_up(_cdiv(B, num_tiles), _SUBLANE)
    Bp = TB * num_tiles

    vmem_est = weight_bytes + TB * bytes_per_row
    vmem_limit = int(min(max(int(vmem_est * 1.5), 32 * 1024 * 1024),
                         60 * 1024 * 1024))

    # --- input padding (batch + input features), bf16 for the MXU -------------
    xp = jnp.pad(x.astype(jnp.bfloat16), ((0, Bp - B), (0, in_p - in_dim)))

    kernel = functools.partial(_bnn_forward_kernel,
                               use_relu=(activation == "relu"))

    out_padded = pl.pallas_call(
        kernel,
        out_shape=jax.ShapeDtypeStruct((Bp, c_p), out_dtype),
        grid=(num_tiles,),
        in_specs=[
            pl.BlockSpec((TB, in_p), lambda i: (i, 0)),   # x: tiled over batch
            _resident_spec((in_p, h_p)),                  # W1 (VMEM resident)
            _resident_spec((1, h_p)),                     # b1
            _resident_spec((h_p, h_p)),                   # W2
            _resident_spec((1, h_p)),                     # b2
            _resident_spec((h_p, c_p)),                   # W3
            _resident_spec((1, c_p)),                     # b3
        ],
        out_specs=pl.BlockSpec((TB, c_p), lambda i: (i, 0)),
        compiler_params=pltpu.CompilerParams(
            dimension_semantics=("parallel",),
            vmem_limit_bytes=vmem_limit),
    )(xp, prepped["w1"], prepped["b1"], prepped["w2"], prepped["b2"],
      prepped["w3"], prepped["b3"])

    return out_padded[:B, :num_classes]


def init_params(key, input_dim, nodes, num_classes):
    """Deterministic init of the weight means (mu) of each BayesianLinear."""
    ks = jax.random.split(key, 6)
    scale = 0.1
    return {
        "w1": scale * jax.random.normal(ks[0], (nodes, input_dim), jnp.float32),
        "b1": scale * jax.random.normal(ks[1], (nodes,), jnp.float32),
        "w2": scale * jax.random.normal(ks[2], (nodes, nodes), jnp.float32),
        "b2": scale * jax.random.normal(ks[3], (nodes,), jnp.float32),
        "w3": scale * jax.random.normal(ks[4], (num_classes, nodes), jnp.float32),
        "b3": scale * jax.random.normal(ks[5], (num_classes,), jnp.float32),
    }


def bnn_forward_ref(x, params, activation="relu", mxu_dtype=jnp.bfloat16):
    """Pure-JAX reference matching the kernel's bf16-matmul / f32-accum math."""
    act = (lambda v: jnp.maximum(v, 0.0)) if activation == "relu" else jnp.tanh

    def mm(a, w):
        return jnp.dot(a.astype(mxu_dtype), w.T.astype(mxu_dtype),
                       preferred_element_type=jnp.float32)

    h1 = act(mm(x, params["w1"]) + params["b1"])
    h2 = act(mm(h1, params["w2"]) + params["b2"])
    z = mm(h2, params["w3"]) + params["b3"]
    return jax.nn.log_softmax(z, axis=1)


if __name__ == "__main__":
    INPUT_DIM = 32
    NODES = 64
    NUM_CLASSES = 8
    BATCH = 8

    key = jax.random.PRNGKey(0)
    k_params, k_x = jax.random.split(key)
    params = init_params(k_params, INPUT_DIM, NODES, NUM_CLASSES)
    x = jax.random.normal(k_x, (BATCH, INPUT_DIM), jnp.float32)

    # One-time weight prep, reused across forward calls.
    prepped = prepare_params(params)

    fwd = jax.jit(bnn_forward,
                  static_argnames=("num_classes", "activation", "block_b",
                                   "out_dtype"))

    for activation in ("relu", "tanh"):
        ref = bnn_forward_ref(x, params, activation=activation)

        # Default bf16 output (halves the HBM writeback stream).
        out = jax.block_until_ready(
            fwd(x, prepped, num_classes=NUM_CLASSES, activation=activation))
        assert out.shape == (BATCH, NUM_CLASSES)
        out32 = out.astype(jnp.float32)
        assert jnp.allclose(out32, ref, atol=3e-2, rtol=2e-2), (
            f"bf16-output mismatch vs reference ({activation})")
        assert jnp.allclose(jnp.sum(jnp.exp(out32), axis=1), 1.0, atol=2e-2)

        # f32 output path for a tight numerical check.
        outf = jax.block_until_ready(
            fwd(x, prepped, num_classes=NUM_CLASSES, activation=activation,
                out_dtype=jnp.float32))
        assert outf.shape == (BATCH, NUM_CLASSES)
        assert jnp.allclose(outf, ref, atol=1e-4, rtol=1e-4), (
            f"f32-output mismatch vs bf16-matched reference ({activation})")
        assert jnp.allclose(jnp.sum(jnp.exp(outf), axis=1), 1.0, atol=1e-4)

    print("KERNEL_OK")
</pallas_src>

<mosaic_0001>
module attributes {stable_mosaic.version = 11 : i64} {
  func.func @_bnn_forward_kernel(%arg0: i32, %arg1: memref<8x128xbf16, #tpu.memory_space<vmem>>, %arg2: memref<128x128xbf16, #tpu.memory_space<vmem>>, %arg3: memref<1x128xf32, #tpu.memory_space<vmem>>, %arg4: memref<128x128xbf16, #tpu.memory_space<vmem>>, %arg5: memref<1x128xf32, #tpu.memory_space<vmem>>, %arg6: memref<128x128xbf16, #tpu.memory_space<vmem>>, %arg7: memref<1x128xf32, #tpu.memory_space<vmem>>, %arg8: memref<8x128xbf16, #tpu.memory_space<vmem>>) attributes {dimension_semantics = [#tpu.dimension_semantics<parallel>], iteration_bounds = array<i64: 1>, scalar_prefetch = 0 : i64, scratch_operands = 0 : i64, tpu.core_type = #tpu.core_type<tc>, window_params = [{transform_indices = @transform_0, window_bounds = array<i64: 8, 128>}, {pipeline_mode = #tpu.pipeline_mode<synchronous>, transform_indices = @transform_1, window_bounds = array<i64: 128, 128>}, {pipeline_mode = #tpu.pipeline_mode<synchronous>, transform_indices = @transform_2, window_bounds = array<i64: 1, 128>}, {pipeline_mode = #tpu.pipeline_mode<synchronous>, transform_indices = @transform_3, window_bounds = array<i64: 128, 128>}, {pipeline_mode = #tpu.pipeline_mode<synchronous>, transform_indices = @transform_4, window_bounds = array<i64: 1, 128>}, {pipeline_mode = #tpu.pipeline_mode<synchronous>, transform_indices = @transform_5, window_bounds = array<i64: 128, 128>}, {pipeline_mode = #tpu.pipeline_mode<synchronous>, transform_indices = @transform_6, window_bounds = array<i64: 1, 128>}, {transform_indices = @transform_7, window_bounds = array<i64: 8, 128>}]} {
    %c0 = arith.constant 0 : index
    %c0_0 = arith.constant 0 : index
    %0 = vector.load %arg1[%c0, %c0_0] : memref<8x128xbf16, #tpu.memory_space<vmem>>, vector<8x128xbf16>
    %c0_1 = arith.constant 0 : index
    %c0_2 = arith.constant 0 : index
    %1 = vector.load %arg2[%c0_1, %c0_2] : memref<128x128xbf16, #tpu.memory_space<vmem>>, vector<128x128xbf16>
    %cst = arith.constant dense<0.000000e+00> : vector<8x128xf32>
    %2 = tpu.matmul %0, %1, %cst {dimension_numbers = #tpu.dot_dimension_numbers<[1], [0], [0], [1], [0, 0, 1, 1], [], []>} : vector<8x128xbf16>, vector<128x128xbf16>, vector<8x128xf32> -> vector<8x128xf32>
    %c0_3 = arith.constant 0 : index
    %c0_4 = arith.constant 0 : index
    %3 = vector.load %arg3[%c0_3, %c0_4] : memref<1x128xf32, #tpu.memory_space<vmem>>, vector<1x128xf32>
    %4 = vector.broadcast %3 : vector<1x128xf32> to vector<8x128xf32>
    %5 = arith.addf %2, %4 : vector<8x128xf32>
    %cst_5 = arith.constant 0.000000e+00 : f32
    %6 = vector.broadcast %cst_5 : f32 to vector<8x128xf32>
    %7 = arith.maximumf %5, %6 : vector<8x128xf32>
    %8 = arith.truncf %7 : vector<8x128xf32> to vector<8x128xbf16>
    %c0_6 = arith.constant 0 : index
    %c0_7 = arith.constant 0 : index
    %9 = vector.load %arg4[%c0_6, %c0_7] : memref<128x128xbf16, #tpu.memory_space<vmem>>, vector<128x128xbf16>
    %cst_8 = arith.constant dense<0.000000e+00> : vector<8x128xf32>
    %10 = tpu.matmul %8, %9, %cst_8 {dimension_numbers = #tpu.dot_dimension_numbers<[1], [0], [0], [1], [0, 0, 1, 1], [], []>} : vector<8x128xbf16>, vector<128x128xbf16>, vector<8x128xf32> -> vector<8x128xf32>
    %c0_9 = arith.constant 0 : index
    %c0_10 = arith.constant 0 : index
    %11 = vector.load %arg5[%c0_9, %c0_10] : memref<1x128xf32, #tpu.memory_space<vmem>>, vector<1x128xf32>
    %12 = vector.broadcast %11 : vector<1x128xf32> to vector<8x128xf32>
    %13 = arith.addf %10, %12 : vector<8x128xf32>
    %cst_11 = arith.constant 0.000000e+00 : f32
    %14 = vector.broadcast %cst_11 : f32 to vector<8x128xf32>
    %15 = arith.maximumf %13, %14 : vector<8x128xf32>
    %16 = arith.truncf %15 : vector<8x128xf32> to vector<8x128xbf16>
    %c0_12 = arith.constant 0 : index
    %c0_13 = arith.constant 0 : index
    %17 = vector.load %arg6[%c0_12, %c0_13] : memref<128x128xbf16, #tpu.memory_space<vmem>>, vector<128x128xbf16>
    %cst_14 = arith.constant dense<0.000000e+00> : vector<8x128xf32>
    %18 = tpu.matmul %16, %17, %cst_14 {dimension_numbers = #tpu.dot_dimension_numbers<[1], [0], [0], [1], [0, 0, 1, 1], [], []>} : vector<8x128xbf16>, vector<128x128xbf16>, vector<8x128xf32> -> vector<8x128xf32>
    %c0_15 = arith.constant 0 : index
    %c0_16 = arith.constant 0 : index
    %19 = vector.load %arg7[%c0_15, %c0_16] : memref<1x128xf32, #tpu.memory_space<vmem>>, vector<1x128xf32>
    %20 = vector.broadcast %19 : vector<1x128xf32> to vector<8x128xf32>
    %21 = arith.addf %18, %20 : vector<8x128xf32>
    %cst_17 = arith.constant dense<0xFF800000> : vector<8xf32>
    %22 = vector.multi_reduction <maximumf>, %21, %cst_17 [1] : vector<8x128xf32> to vector<8xf32>
    %23 = vector.shape_cast %22 : vector<8xf32> to vector<8x1xf32>
    %24 = vector.broadcast %23 : vector<8x1xf32> to vector<8x128xf32>
    %25 = arith.subf %21, %24 : vector<8x128xf32>
    %26 = math.exp %25 : vector<8x128xf32>
    %cst_18 = arith.constant dense<0.000000e+00> : vector<8xf32>
    %27 = vector.multi_reduction <add>, %26, %cst_18 [1] : vector<8x128xf32> to vector<8xf32>
    %28 = vector.shape_cast %27 : vector<8xf32> to vector<8x1xf32>
    %29 = math.log %28 : vector<8x1xf32>
    %30 = vector.broadcast %29 : vector<8x1xf32> to vector<8x128xf32>
    %31 = arith.subf %25, %30 : vector<8x128xf32>
    %32 = arith.truncf %31 : vector<8x128xf32> to vector<8x128xbf16>
    %c0_19 = arith.constant 0 : index
    %c0_20 = arith.constant 0 : index
    %33 = vector.load %arg8[%c0_19, %c0_20] : memref<8x128xbf16, #tpu.memory_space<vmem>>, vector<8x128xbf16>
    tpu.vector_store %arg8[%c0_19, %c0_20], %32 {strides = array<i32>} : memref<8x128xbf16, #tpu.memory_space<vmem>>, vector<8x128xbf16>,
    return
  }
  func.func @transform_0(%arg0: i32) -> (i32, i32) {
    %c0_i32 = arith.constant 0 : i32
    %c0_i32_0 = arith.constant 0 : i32
    return %arg0, %c0_i32 : i32, i32
  }
  func.func @transform_1(%arg0: i32) -> (i32, i32) {
    %c0_i32 = arith.constant 0 : i32
    %c0_i32_0 = arith.constant 0 : i32
    %c0_i32_1 = arith.constant 0 : i32
    return %c0_i32, %c0_i32_0 : i32, i32
  }
  func.func @transform_2(%arg0: i32) -> (i32, i32) {
    %c0_i32 = arith.constant 0 : i32
    %c0_i32_0 = arith.constant 0 : i32
    %c0_i32_1 = arith.constant 0 : i32
    return %c0_i32, %c0_i32_0 : i32, i32
  }
  func.func @transform_3(%arg0: i32) -> (i32, i32) {
    %c0_i32 = arith.constant 0 : i32
    %c0_i32_0 = arith.constant 0 : i32
    %c0_i32_1 = arith.constant 0 : i32
    return %c0_i32, %c0_i32_0 : i32, i32
  }
  func.func @transform_4(%arg0: i32) -> (i32, i32) {
    %c0_i32 = arith.constant 0 : i32
    %c0_i32_0 = arith.constant 0 : i32
    %c0_i32_1 = arith.constant 0 : i32
    return %c0_i32, %c0_i32_0 : i32, i32
  }
  func.func @transform_5(%arg0: i32) -> (i32, i32) {
    %c0_i32 = arith.constant 0 : i32
    %c0_i32_0 = arith.constant 0 : i32
    %c0_i32_1 = arith.constant 0 : i32
    return %c0_i32, %c0_i32_0 : i32, i32
  }
  func.func @transform_6(%arg0: i32) -> (i32, i32) {
    %c0_i32 = arith.constant 0 : i32
    %c0_i32_0 = arith.constant 0 : i32
    %c0_i32_1 = arith.constant 0 : i32
    return %c0_i32, %c0_i32_0 : i32, i32
  }
  func.func @transform_7(%arg0: i32) -> (i32, i32) {
    %c0_i32 = arith.constant 0 : i32
    %c0_i32_0 = arith.constant 0 : i32
    return %arg0, %c0_i32 : i32, i32
  }
}

</mosaic_0001>

<bundles_post_ra>
// kernel: bnn_forward.1
= control target key start
LH: loop header
LB: loop body
LE: loop exit
PB: predicated region body
PF: predicated region fallthrough
CT: control target
= control target key end

     0   :  { %12 = vsyncpa [#allocation3], 0  ;;  %s833_s0 = inlined_call_operand.vmem [shape: bf16[8,128], index: 0, kind: input, shape index: {}]   ;;  %s834_s1 = inlined_call_operand.hbm [shape: bf16[128,128], index: 1, kind: input, shape index: {}]   ;;  %s835_s2 = inlined_call_operand.vmem [shape: f32[1,128], index: 2, kind: input, shape index: {}]   ;;  %s836_s3 = inlined_call_operand.hbm [shape: bf16[128,128], index: 3, kind: input, shape index: {}]   ;;  %s837_s4 = inlined_call_operand.vmem [shape: f32[1,128], index: 4, kind: input, shape index: {}]   ;;  %s838_s5 = inlined_call_operand.hbm [shape: bf16[128,128], index: 5, kind: input, shape index: {}]   ;;  %s839_s6 = inlined_call_operand.vmem [shape: f32[1,128], index: 6, kind: input, shape index: {}]   ;;  %s840_s7 = inlined_call_operand.hbm [shape: bf16[8,128], index: 7, kind: output, shape index: {}]  }
   0x1   :  { %13 = vsyncpa [#allocation6], 0 }
   0x2   :  { %14 = vsyncpa [#allocation4], 0  ;;  %s679_s24 = smov [#allocation5]   ;;  %s680_s26 = smov [#allocation2]  }
   0x3   :  { %s36_s25 = sshll.u32 %s679_s24, 4  ;;  %s22_s27 = sshll.u32 %s680_s26, 4  ;;  %s37_s25 = int_to_ptr.vmem [resolvable:$true] %s36_s25  ;;  %s727_s27 = int_to_ptr.vmem [resolvable:$true] %s22_s27 }
   0x4   :  { %s585_s30 = scalar_lea.hbm %s836_s3, 1024 }
   0x5   :  { %p586_p0 = scmp.ne.s32.totalorder %s836_s3, %s585_s30  ;;  %p589_p1 = scmp.lt.u32.totalorder %s585_s30, %s836_s3 }
   0x7   :  { %p591_p2 = pnand %p589_p1, %p586_p0 }
   0x9   :  { %594 = shalt.err (!%p591_p2)
}
   0xa   :  { %s595_s12 = scalar_lea.vmem %s37_s25, 1024  ;;  %p600_p4 = scmp.lt.s32.totalorder %s37_s25, %s37_s25 }
   0xb   :  { %p596_p3 = scmp.ne.s32.totalorder %s37_s25, %s595_s12  ;;  %p601_p5 = scmp.lt.s32.totalorder %s595_s12, %s595_s12 }
   0xd   :  { %p602_p6 = por %p601_p5, %p600_p4 }
   0xf   :  { %p603_p7 = pnand %p602_p6, %p596_p3 }
  0x11   :  { %606 = shalt.err (!%p603_p7)
}
  0x12   :  { %s681_s13 = smov 64   ;;  %s682_s14 = smov 4  }
  0x13   :  { %42 = dma.hbm_to_vmem [thread:$0]  %s836_s3, 1024, %s37_s25, [#allocation6], %s681_s13, %s681_s13, %s682_s14  }
  0x14   :  { %s607_s19 = scalar_lea.hbm %s834_s1, 1024 }
  0x15   :  { %p608_p8 = scmp.ne.s32.totalorder %s834_s1, %s607_s19  ;;  %p611_p9 = scmp.lt.u32.totalorder %s607_s19, %s834_s1 }
  0x17   :  { %p613_p10 = pnand %p611_p9, %p608_p8 }
  0x19   :  { %616 = shalt.err (!%p613_p10)
}
  0x1a   :  { %s617_s24 = scalar_lea.vmem %s727_s27, 1024  ;;  %p622_p12 = scmp.lt.s32.totalorder %s727_s27, %s727_s27 }
  0x1b   :  { %p618_p11 = scmp.ne.s32.totalorder %s727_s27, %s617_s24  ;;  %p623_p13 = scmp.lt.s32.totalorder %s617_s24, %s617_s24 }
  0x1d   :  { %p624_p0 = por %p623_p13, %p622_p12 }
  0x1f   :  { %p625_p1 = pnand %p624_p0, %p618_p11 }
  0x21   :  { %628 = shalt.err (!%p625_p1)
}
  0x22   :  { %28 = dma.hbm_to_vmem [thread:$0]  %s834_s1, 1024, %s727_s27, [#allocation3], %s681_s13, %s681_s13, %s682_s14  }
  0x23   :  { %s683_s26 = smov [#allocation7]   ;;  %s629_s8 = scalar_lea.hbm %s838_s5, 1024 }
  0x24   :  { %s50_s28 = sshll.u32 %s683_s26, 4  ;;  %p630_p2 = scmp.ne.s32.totalorder %s838_s5, %s629_s8  ;;  %s51_s28 = int_to_ptr.vmem [resolvable:$true] %s50_s28 }
  0x25   :  { %p633_p3 = scmp.lt.u32.totalorder %s629_s8, %s838_s5 }
  0x27   :  { %p635_p4 = pnand %p633_p3, %p630_p2 }
  0x29   :  { %638 = shalt.err (!%p635_p4)
}
  0x2a   :  { %s639_s15 = scalar_lea.vmem %s51_s28, 1024  ;;  %p644_p6 = scmp.lt.s32.totalorder %s51_s28, %s51_s28 }
  0x2b   :  { %p640_p5 = scmp.ne.s32.totalorder %s51_s28, %s639_s15  ;;  %p645_p7 = scmp.lt.s32.totalorder %s639_s15, %s639_s15 }
  0x2d   :  { %p646_p8 = por %p645_p7, %p644_p6 }
  0x2f   :  { %p647_p9 = pnand %p646_p8, %p640_p5 }
  0x31   :  { %650 = shalt.err (!%p647_p9)
}
  0x32   :  { %56 = dma.hbm_to_vmem [thread:$0]  %s838_s5, 1024, %s51_s28, [#allocation6], %s681_s13, %s681_s13, %s682_s14  }
  0x33   :  { %673 = dma.done.wait [#allocation3], 1024  }
  0x34   :  { %674 = vsyncadd [#allocation3], 4294966272 }
  0x35   :  { %675 = dma.done.wait [#allocation6], 2048  }
  0x36   :  { %676 = vsyncadd [#allocation6], 4294965248  ;;  %v684_v0 = vmov 0.0   ;;  %vm685_vm0 = vmmov 0   ;;  %v557_v1 = vld [vmem:[#allocation2] sm:$0xff]   ;;  %v558_v2 = vld [vmem:[#allocation2 + $0x8] sm:$0xff]  }
  0x37   :  { %489 = vmatprep.subr.bf16.mxu0 %v684_v0  ;;  %505 = vmatprep.mubr.msk.bf16.mxu0 %vm685_vm0, %v684_v0  ;;  %v559_v3 = vld [vmem:[#allocation2 + $0x10] sm:$0xff]   ;;  %v565_v4 = vld [vmem:[#allocation5] sm:$0xff]   ;;  %v560_v5 = vld [vmem:[#allocation2 + $0x18] sm:$0xff]  }
  0x38   :  { %509 = vmatprep.subr.bf16.mxu1 %v684_v0  ;;  %525 = vmatprep.mubr.msk.bf16.mxu1 %vm685_vm0, %v684_v0  ;;  %v566_v6 = vld [vmem:[#allocation5 + $0x8] sm:$0xff]   ;;  %v561_v7 = vld [vmem:[#allocation2 + $0x20] sm:$0xff]   ;;  %v567_v8 = vld [vmem:[#allocation5 + $0x10] sm:$0xff]  }
  0x39   :  { %490 = vmatpush3.bf16.msra.mxu0 %v557_v1  ;;  %510 = vmatpush3.bf16.msra.mxu1 %v565_v4  ;;  %v562_v9 = vld [vmem:[#allocation2 + $0x28] sm:$0xff]   ;;  %v568_v10 = vld [vmem:[#allocation5 + $0x18] sm:$0xff]   ;;  %v563_v11 = vld [vmem:[#allocation2 + $0x30] sm:$0xff]  }
  0x3a   :  { %491 = vmatprep.subr.bf16.mxu0 %v684_v0  ;;  %511 = vmatprep.subr.bf16.mxu1 %v684_v0  ;;  %v569_v12 = vld [vmem:[#allocation5 + $0x20] sm:$0xff]   ;;  %v564_v13 = vld [vmem:[#allocation2 + $0x38] sm:$0xff]   ;;  %v570_v14 = vld [vmem:[#allocation5 + $0x28] sm:$0xff]  }
  0x3b   :  { %v69_v15 = vld [vmem:[%s833_s0] sm:$0xf]  ;;  %v571_v16 = vld [vmem:[#allocation5 + $0x30] sm:$0xff]   ;;  %v572_v17 = vld [vmem:[#allocation5 + $0x38] sm:$0xff]  }
  0x3c   :  { %v573_v18 = vld [vmem:[#allocation7] sm:$0xff]   ;;  %v574_v19 = vld [vmem:[#allocation7 + $0x8] sm:$0xff]   ;;  %v575_v20 = vld [vmem:[#allocation7 + $0x10] sm:$0xff]  }
  0x3d   :  { %492 = vmatpush3.bf16.msra.mxu0 %v558_v2  ;;  %512 = vmatpush3.bf16.msra.mxu1 %v566_v6  ;;  %v576_v21 = vld [vmem:[#allocation7 + $0x18] sm:$0xff]   ;;  %v577_v22 = vld [vmem:[#allocation7 + $0x20] sm:$0xff]   ;;  %v578_v23 = vld [vmem:[#allocation7 + $0x28] sm:$0xff]  }
  0x3e   :  { %493 = vmatprep.subr.bf16.mxu0 %v684_v0  ;;  %513 = vmatprep.subr.bf16.mxu1 %v684_v0  ;;  %v435_v24 = vld [vmem:[%s835_s2] ss:$0 sm:$0xff]  ;;  %v579_v32 = vld [vmem:[#allocation7 + $0x30] sm:$0xff]   ;;  %v580_v33 = vld [vmem:[#allocation7 + $0x38] sm:$0xff]  }
  0x3f   :  { %v444_v34 = vld [vmem:[%s837_s4] ss:$0 sm:$0xff]  ;;  %s686_s4 = smov [#allocation8]  }
  0x40   :  { %v453_v42 = vld [vmem:[%s839_s6] ss:$0 sm:$0xff]  ;;  %s425_s19 = sshll.u32 %s686_s4, 4  ;;  %s426_s19 = int_to_ptr.vmem [resolvable:$true] %s425_s19 }
  0x41   :  { %494 = vmatpush3.bf16.msra.mxu0 %v559_v3  ;;  %514 = vmatpush3.bf16.msra.mxu1 %v567_v8  ;;  %s651_s6 = scalar_lea.vmem %s426_s19, 64  ;;  %p656_p11 = scmp.lt.s32.totalorder %s426_s19, %s426_s19 }
  0x42   :  { %495 = vmatprep.subr.bf16.mxu0 %v684_v0  ;;  %515 = vmatprep.subr.bf16.mxu1 %v684_v0  ;;  %p652_p10 = scmp.ne.s32.totalorder %s426_s19, %s651_s6  ;;  %p657_p12 = scmp.lt.s32.totalorder %s651_s6, %s651_s6 }
  0x44   :  { %p658_p13 = por %p657_p12, %p656_p11 }
  0x45   :  { %496 = vmatpush3.bf16.msra.mxu0 %v560_v5  ;;  %516 = vmatpush3.bf16.msra.mxu1 %v568_v10 }
  0x46   :  { %497 = vmatprep.subr.bf16.mxu0 %v684_v0  ;;  %517 = vmatprep.subr.bf16.mxu1 %v684_v0  ;;  %p659_p0 = pnand %p658_p13, %p652_p10 }
  0x49   :  { %498 = vmatpush3.bf16.msra.mxu0 %v561_v7  ;;  %518 = vmatpush3.bf16.msra.mxu1 %v569_v12 }
  0x4a   :  { %499 = vmatprep.subr.bf16.mxu0 %v684_v0  ;;  %519 = vmatprep.subr.bf16.mxu1 %v684_v0 }
  0x4d   :  { %500 = vmatpush3.bf16.msra.mxu0 %v562_v9  ;;  %520 = vmatpush3.bf16.msra.mxu1 %v570_v14 }
  0x4e   :  { %501 = vmatprep.subr.bf16.mxu0 %v684_v0  ;;  %521 = vmatprep.subr.bf16.mxu1 %v684_v0 }
  0x51   :  { %502 = vmatpush3.bf16.msra.mxu0 %v563_v11  ;;  %522 = vmatpush3.bf16.msra.mxu1 %v571_v16 }
  0x52   :  { %503 = vmatprep.subr.bf16.mxu0 %v684_v0  ;;  %523 = vmatprep.subr.bf16.mxu1 %v684_v0 }
  0x55   :  { %504 = vmatpush3.bf16.msra.mxu0 %v564_v13  ;;  %524 = vmatpush3.bf16.msra.mxu1 %v572_v17 }
  0x56   :  { %529 = vmatprep.subr.bf16.mxu0 %v684_v0 }
  0x58   :  { %506 = vmatmul.mubr.bf16.vlgmr.msra.gmra.mrb[0].mxu0 %v69_v15 }
  0x59   :  { %545 = vmatprep.mubr.msk.bf16.mxu0 %vm685_vm0, %v684_v0  ;;  %530 = vmatpush3.bf16.msra.mxu0 %v573_v18 }
  0x5a   :  { %531 = vmatprep.subr.bf16.mxu0 %v684_v0 }
  0x5d   :  { %532 = vmatpush3.bf16.msra.mxu0 %v574_v19 }
  0x5e   :  { %533 = vmatprep.subr.bf16.mxu0 %v684_v0 }
  0x61   :  { %534 = vmatpush3.bf16.msra.mxu0 %v575_v20 }
  0x62   :  { %535 = vmatprep.subr.bf16.mxu0 %v684_v0 }
  0x65   :  { %536 = vmatpush3.bf16.msra.mxu0 %v576_v21 }
  0x66   :  { %537 = vmatprep.subr.bf16.mxu0 %v684_v0 }
  0x69   :  { %538 = vmatpush3.bf16.msra.mxu0 %v577_v22 }
  0x6a   :  { %539 = vmatprep.subr.bf16.mxu0 %v684_v0 }
  0x6d   :  { %540 = vmatpush3.bf16.msra.mxu0 %v578_v23 }
  0x6e   :  { %541 = vmatprep.subr.bf16.mxu0 %v684_v0 }
  0x71   :  { %542 = vmatpush3.bf16.msra.mxu0 %v579_v32 }
  0x72   :  { %543 = vmatprep.subr.bf16.mxu0 %v684_v0 }
  0x75   :  { %544 = vmatpush3.bf16.msra.mxu0 %v580_v33 }
 0x12b   :  { %v175_v25 = vpop.f32.mrb[0].mxu0 }
 0x12c   :  { %v176_v26 = vadd.f32 %v435_v24, %v175_v25  ;;  %v507_v27 = vpop.f32.mrb[1].mxu0 }
 0x12d   :  { %v178_v28 = vpop.f32.mrb[2].mxu0 }
 0x12e   :  { %v181_v29 = vmax.f32 %v176_v26, 0.0  ;;  %v508_v30 = vpop.f32.mrb[3].mxu0 }
 0x130   :  { %v182_v31 = vpack.c.bf16 %v181_v29, %v181_v29 }
 0x132   :  { %526 = vmatmul.mubr.bf16.vlgmr.msra.gmra.mrb[0].mxu1 %v182_v31 }
 0x205   :  { %v288_v35 = vpop.f32.mrb[0].mxu1 }
 0x206   :  { %v289_v36 = vadd.f32 %v444_v34, %v288_v35  ;;  %v527_v37 = vpop.f32.mrb[1].mxu1 }
 0x207   :  { %v291_v38 = vpop.f32.mrb[2].mxu1 }
 0x208   :  { %v294_v39 = vmax.f32 %v289_v36, 0.0  ;;  %v528_v40 = vpop.f32.mrb[3].mxu1 }
 0x20a   :  { %v295_v41 = vpack.c.bf16 %v294_v39, %v294_v39 }
 0x20c   :  { %546 = vmatmul.mubr.bf16.vlgmr.msra.gmra.mrb[4].mxu0 %v295_v41 }
 0x2df   :  { %v401_v43 = vpop.f32.mrb[4].mxu0 }
 0x2e0   :  { %v402_v44 = vadd.f32 %v453_v42, %v401_v43  ;;  %v547_v45 = vpop.f32.mrb[5].mxu0 }
 0x2e1   :  { %v404_v46 = vpop.f32.mrb[6].mxu0 }
 0x2e2   :  { %407 = vmax.xlane.f32.xlu0 %v402_v44  ;;  %v548_v47 = vpop.f32.mrb[7].mxu0 }
 0x36f   :  { %v408_v48 = vpop.xlane.xlu0 %407 }
 0x370   :  { %v409_v49 = vsub.f32 %v402_v44, %v408_v48 }
 0x372   :  { %v410_v50 = vmul.f32 1.442695, %v409_v49 }
 0x374   :  { %581 = vpow2.f32 %v410_v50 }
 0x37e   :  { %v582_v51 = vpop.eup %581 }
 0x37f   :  { %412 = vadd.xlane.f32.xlu0 %v582_v51 }
 0x40c   :  { %v413_v52 = vpop.xlane.xlu0 %412 }
 0x40d   :  { %583 = vlog2.f32 %v413_v52 }
 0x417   :  { %v584_v53 = vpop.eup %583 }
 0x418   :  { %v415_v54 = vmul.f32 0.6931472, %v584_v53 }
 0x41a   :  { %v416_v55 = vsub.f32 %v409_v49, %v415_v54 }
 0x41c   :  { %v417_v56 = vpack.c.bf16 %v416_v55, %v416_v55 }
 0x41e   :  { %418 = vst [vmem:[#allocation8] sm:$0xf] %v417_v56 }
 0x41f   :  { %662 = shalt.err (!%p659_p0)
}
 0x420   :  { %s663_s22 = scalar_lea.hbm %s840_s7, 64 }
 0x421   :  { %p664_p1 = scmp.ne.s32.totalorder %s840_s7, %s663_s22  ;;  %p667_p2 = scmp.lt.u32.totalorder %s663_s22, %s840_s7 }
 0x423   :  { %p669_p3 = pnand %p667_p2, %p664_p1 }
 0x425   :  { %672 = shalt.err (!%p669_p3)
}
 0x426   :  { %428 = dma.vmem_to_hbm [thread:$0]  %s426_s19, 64, %s840_s7, [#allocation4]  }
 0x427   :  { %677 = dma.done.wait [#allocation4], 64  }
 0x428   :  { %678 = vsyncadd [#allocation4], 4294967232 }
 0x429   :  { %432 = vsyncpa [#allocation3], 1 }
 0x42a   :  { %433 = vsyncpa [#allocation6], 1 }
 0x42b   :  { %434 = vsyncpa [#allocation4], 1 }

</bundles_post_ra>
